<compile_context>
chip_gen: v5e
topology: v5e:2x2
jax: 0.10.0
libtpu: 0.0.40
codegen_flags: <defaults>
</compile_context>

<pallas_src>
import jax
import jax.numpy as jnp
import numpy as np
from jax.experimental import pallas as pl
from jax.experimental.pallas import tpu as pltpu


_SMALL_FAST_PATH_BYTES = 256 * 1024       # below this, plain XLA fusion wins
_TARGET_BLOCK_BYTES = 2 * 1024 * 1024     # ~2 MiB z block -> ~9 MiB pipelined footprint
                                          # (safe on v5e/v6e/v7x default scoped VMEM)


def _round_up(x, m):
    return ((x + m - 1) // m) * m


def _largest_aligned_divisor(n, align, cap):
    """Largest multiple of `align` that divides n and is <= cap (assumes n % align == 0)."""
    best = align
    k_max = max(1, min(n, cap) // align)
    for k in range(1, k_max + 1):
        d = align * k
        if n % d == 0:
            best = d
    return best


def _choose_time_block(T, C, itemsize, target_bytes):
    """Pick (Tt, Tp) so that T padding is avoided whenever possible."""
    budget = max(128, (target_bytes // max(1, C * itemsize)) // 128 * 128)
    if T % 128 == 0:
        return _largest_aligned_divisor(T, 128, min(budget, T)), T
    if C * T * itemsize <= 2 * target_bytes:
        return T, T  # full-extent T block: exempt from the x128 rule, no padding
    # Fallback: minimal padding (<128 elems per row) to the next multiple of 128.
    Tp = _round_up(T, 128)
    return _largest_aligned_divisor(Tp, 128, min(budget, Tp)), Tp


def _choose_batch_block(B, bytes_per_batch_block, target_bytes, t_blocks):
    best = 1
    for bt in range(1, B + 1):
        if B % bt == 0 and bt * bytes_per_batch_block <= target_bytes:
            best = bt
    # Leave an even parallel split for the v7x megacore when the whole tensor
    # would otherwise be a single grid step.
    if (B // best) * t_blocks == 1 and B % 2 == 0:
        best = B // 2
    return max(1, best)


def actnorm_kernel(z_ref, mask_ref, scale_ref, bias_ref, zout_ref):
    """One (Bt, C, Tt) tile of: z_out = (z * scale + bias) * mask."""
    z = z_ref[...].astype(jnp.float32)           # (Bt, C, Tt)
    mask = mask_ref[...].astype(jnp.float32)     # (Bt, 1, Tt)  broadcast over C
    scale = scale_ref[...].astype(jnp.float32)   # (1, C, 1)    broadcast over B, T
    bias = bias_ref[...].astype(jnp.float32)     # (1, C, 1)
    zout_ref[...] = ((z * scale + bias) * mask).astype(zout_ref.dtype)


def actnorm_forward(z, z_mask, log_df_dz, log_scale, bias,
                    *, target_block_bytes=_TARGET_BLOCK_BYTES, use_pallas=None):
    """ActNorm forward: returns (z_out, log_df_dz_out). Matches the PyTorch module.

    z: (B, C, T); z_mask: (B, 1, T); log_scale/bias: (1, C, 1); log_df_dz: (B,).
    """
    B, C, T = z.shape
    itemsize = jnp.dtype(z.dtype).itemsize

    # Hoisted tiny-parameter work (EUP off the hot path) + log-det update in JAX.
    scale = jnp.exp(log_scale).astype(jnp.float32)          # (1, C, 1)
    bias_f = bias.astype(jnp.float32)                       # (1, C, 1)
    length = jnp.sum(z_mask.astype(jnp.float32), axis=(1, 2))   # (B,)
    ldz_out = log_df_dz + jnp.sum(log_scale) * length           # (B,)

    # Small-tensor fast path: launch/per-step overhead dominates below ~256 KiB.
    if use_pallas is None:
        use_pallas = B * C * T * itemsize >= _SMALL_FAST_PATH_BYTES
    if not use_pallas:
        z_out = ((z.astype(jnp.float32) * scale + bias_f)
                 * z_mask.astype(jnp.float32)).astype(z.dtype)
        return z_out, ldz_out

    # --- Tile sizing: full-extent C block (C never padded), padding-aware Tt. ---
    Tt, Tp = _choose_time_block(T, C, itemsize, target_block_bytes)
    Bt = _choose_batch_block(B, C * Tt * itemsize, target_block_bytes, Tp // Tt)

    z_p, mask_p = z, z_mask
    if Tp != T:  # minimal T padding (<128 elems/row); masked region -> output 0.
        z_p = jnp.pad(z_p, ((0, 0), (0, 0), (0, Tp - T)))
        mask_p = jnp.pad(mask_p, ((0, 0), (0, 0), (0, Tp - T)))

    grid = (B // Bt, Tp // Tt)

    mask_itemsize = jnp.dtype(z_mask.dtype).itemsize
    cost = pl.CostEstimate(
        flops=int(3 * B * C * Tp),
        transcendentals=0,
        bytes_accessed=int(2 * B * C * Tp * itemsize
                           + B * Tp * mask_itemsize + 2 * C * 4),
    )

    z_out_p = pl.pallas_call(
        actnorm_kernel,
        out_shape=jax.ShapeDtypeStruct((B, C, Tp), z.dtype),
        grid=grid,
        in_specs=[
            pl.BlockSpec((Bt, C, Tt), lambda b, t: (b, 0, t)),   # z
            pl.BlockSpec((Bt, 1, Tt), lambda b, t: (b, 0, t)),   # z_mask
            pl.BlockSpec((1, C, 1), lambda b, t: (0, 0, 0)),     # exp(log_scale)
            pl.BlockSpec((1, C, 1), lambda b, t: (0, 0, 0)),     # bias
        ],
        out_specs=pl.BlockSpec((Bt, C, Tt), lambda b, t: (b, 0, t)),
        compiler_params=pltpu.CompilerParams(
            dimension_semantics=("parallel", "parallel")),
        cost_estimate=cost,
    )(z_p, mask_p, scale, bias_f)

    z_out = z_out_p if Tp == T else z_out_p[:, :, :T]
    return z_out, ldz_out


def actnorm_data_dependent_init(x, x_mask, eps_var=1e-6):
    """Mirrors ActNorm.initialize() (run on first forward); plain-JAX glue."""
    C = x.shape[1]
    x = x.astype(jnp.float32)
    x_mask = x_mask.astype(jnp.float32)
    denom = jnp.maximum(jnp.sum(x_mask, axis=(0, 2)), 1e-6)  # guard fully-masked case
    m = jnp.sum(x * x_mask, axis=(0, 2)) / denom             # (C,)
    m_sq = jnp.sum(x * x * x_mask, axis=(0, 2)) / denom      # (C,)
    v = m_sq - m * m
    logs = 0.5 * jnp.log(jnp.maximum(v, eps_var))
    bias_init = (-m * jnp.exp(-logs)).reshape(1, C, 1)
    logs_init = (-logs).reshape(1, C, 1)
    return logs_init, bias_init


if __name__ == "__main__":
    key = jax.random.PRNGKey(0)

    def reference(z, z_mask, ldz, log_scale, bias):
        z_out = (z * jnp.exp(log_scale) + bias) * z_mask
        length = jnp.sum(z_mask, axis=(1, 2))
        return z_out, ldz + jnp.sum(log_scale) * length

    cases = [
        (2, 4, 16),    # tiny demo shape (Pallas path forced; full-extent C & T block)
        (2, 6, 200),   # unaligned T -> full-extent T block, no padding
        (2, 8, 256),   # T multiple of 128 -> aligned divisor Tt, no padding
    ]
    all_ok = True
    for (B, C, T) in cases:
        key, k1 = jax.random.split(key)
        z = jax.random.normal(k1, (B, C, T), dtype=jnp.float32) * 2.0 + 0.5
        lengths = jnp.maximum(1, T - jnp.arange(B) * max(1, T // 4)).astype(jnp.int32)
        z_mask = (jnp.arange(T)[None, :] < lengths[:, None]).astype(jnp.float32)
        z_mask = z_mask[:, None, :]                              # (B, 1, T)
        log_df_dz = jnp.zeros((B,), dtype=jnp.float32)

        # Parameters start as zeros (1, C, 1); first forward() does the
        # data-dependent init, mirrored here in plain JAX.
        log_scale, bias = actnorm_data_dependent_init(z, z_mask)

        # Force the Pallas path so the kernel is exercised even at tiny shapes.
        z_out, ldz_out = actnorm_forward(z, z_mask, log_df_dz, log_scale, bias,
                                         use_pallas=True)
        jax.block_until_ready((z_out, ldz_out))

        z_ref, ldz_ref = reference(z, z_mask, log_df_dz, log_scale, bias)
        all_ok &= bool(np.allclose(np.asarray(z_out), np.asarray(z_ref),
                                   atol=1e-5, rtol=1e-5))
        all_ok &= bool(np.allclose(np.asarray(ldz_out), np.asarray(ldz_ref),
                                   atol=1e-5, rtol=1e-5))

    # Also exercise the auto dispatch (tiny input -> XLA fast path).
    B, C, T = 2, 4, 16
    key, k1 = jax.random.split(key)
    z = jax.random.normal(k1, (B, C, T), dtype=jnp.float32)
    z_mask = jnp.ones((B, 1, T), jnp.float32)
    log_df_dz = jnp.zeros((B,), jnp.float32)
    log_scale, bias = actnorm_data_dependent_init(z, z_mask)
    z_out, ldz_out = actnorm_forward(z, z_mask, log_df_dz, log_scale, bias)
    jax.block_until_ready((z_out, ldz_out))
    z_ref, ldz_ref = reference(z, z_mask, log_df_dz, log_scale, bias)
    all_ok &= bool(np.allclose(np.asarray(z_out), np.asarray(z_ref),
                               atol=1e-5, rtol=1e-5))
    all_ok &= bool(np.allclose(np.asarray(ldz_out), np.asarray(ldz_ref),
                               atol=1e-5, rtol=1e-5))

    assert all_ok
    print("KERNEL_OK")
</pallas_src>

<mosaic_0001>
module attributes {stable_mosaic.version = 11 : i64} {
  func.func @actnorm_kernel(%arg0: i32, %arg1: i32, %arg2: memref<1x4x16xf32, #tpu.memory_space<vmem>>, %arg3: memref<1x1x16xf32, #tpu.memory_space<vmem>>, %arg4: memref<1x4x1xf32, #tpu.memory_space<vmem>>, %arg5: memref<1x4x1xf32, #tpu.memory_space<vmem>>, %arg6: memref<1x4x16xf32, #tpu.memory_space<vmem>>) attributes {dimension_semantics = [#tpu.dimension_semantics<parallel>, #tpu.dimension_semantics<parallel>], iteration_bounds = array<i64: 2, 1>, scalar_prefetch = 0 : i64, scratch_operands = 0 : i64, tpu.core_type = #tpu.core_type<tc>, window_params = [{transform_indices = @transform_0, window_bounds = array<i64: 1, 4, 16>}, {transform_indices = @transform_1, window_bounds = array<i64: 1, 1, 16>}, {pipeline_mode = #tpu.pipeline_mode<synchronous>, transform_indices = @transform_2, window_bounds = array<i64: 1, 4, 1>}, {pipeline_mode = #tpu.pipeline_mode<synchronous>, transform_indices = @transform_3, window_bounds = array<i64: 1, 4, 1>}, {transform_indices = @transform_4, window_bounds = array<i64: 1, 4, 16>}]} {
    %c0 = arith.constant 0 : index
    %c0_0 = arith.constant 0 : index
    %c0_1 = arith.constant 0 : index
    %0 = vector.load %arg2[%c0, %c0_0, %c0_1] : memref<1x4x16xf32, #tpu.memory_space<vmem>>, vector<1x4x16xf32>
    %c0_2 = arith.constant 0 : index
    %c0_3 = arith.constant 0 : index
    %c0_4 = arith.constant 0 : index
    %1 = vector.load %arg3[%c0_2, %c0_3, %c0_4] : memref<1x1x16xf32, #tpu.memory_space<vmem>>, vector<1x1x16xf32>
    %c0_5 = arith.constant 0 : index
    %c0_6 = arith.constant 0 : index
    %c0_7 = arith.constant 0 : index
    %2 = vector.load %arg4[%c0_5, %c0_6, %c0_7] : memref<1x4x1xf32, #tpu.memory_space<vmem>>, vector<1x4x1xf32>
    %c0_8 = arith.constant 0 : index
    %c0_9 = arith.constant 0 : index
    %c0_10 = arith.constant 0 : index
    %3 = vector.load %arg5[%c0_8, %c0_9, %c0_10] : memref<1x4x1xf32, #tpu.memory_space<vmem>>, vector<1x4x1xf32>
    %4 = vector.broadcast %2 : vector<1x4x1xf32> to vector<1x4x16xf32>
    %5 = arith.mulf %0, %4 : vector<1x4x16xf32>
    %6 = vector.broadcast %3 : vector<1x4x1xf32> to vector<1x4x16xf32>
    %7 = arith.addf %5, %6 : vector<1x4x16xf32>
    %8 = vector.broadcast %1 : vector<1x1x16xf32> to vector<1x4x16xf32>
    %9 = arith.mulf %7, %8 : vector<1x4x16xf32>
    %c0_11 = arith.constant 0 : index
    %c0_12 = arith.constant 0 : index
    %c0_13 = arith.constant 0 : index
    %10 = vector.load %arg6[%c0_11, %c0_12, %c0_13] : memref<1x4x16xf32, #tpu.memory_space<vmem>>, vector<1x4x16xf32>
    tpu.vector_store %arg6[%c0_11, %c0_12, %c0_13], %9 {strides = array<i32>} : memref<1x4x16xf32, #tpu.memory_space<vmem>>, vector<1x4x16xf32>,
    return
  }
  func.func @transform_0(%arg0: i32, %arg1: i32) -> (i32, i32, i32) {
    %c0_i32 = arith.constant 0 : i32
    %c0_i32_0 = arith.constant 0 : i32
    return %arg0, %c0_i32, %arg1 : i32, i32, i32
  }
  func.func @transform_1(%arg0: i32, %arg1: i32) -> (i32, i32, i32) {
    %c0_i32 = arith.constant 0 : i32
    %c0_i32_0 = arith.constant 0 : i32
    return %arg0, %c0_i32, %arg1 : i32, i32, i32
  }
  func.func @transform_2(%arg0: i32, %arg1: i32) -> (i32, i32, i32) {
    %c0_i32 = arith.constant 0 : i32
    %c0_i32_0 = arith.constant 0 : i32
    %c0_i32_1 = arith.constant 0 : i32
    %c0_i32_2 = arith.constant 0 : i32
    return %c0_i32, %c0_i32_0, %c0_i32_1 : i32, i32, i32
  }
  func.func @transform_3(%arg0: i32, %arg1: i32) -> (i32, i32, i32) {
    %c0_i32 = arith.constant 0 : i32
    %c0_i32_0 = arith.constant 0 : i32
    %c0_i32_1 = arith.constant 0 : i32
    %c0_i32_2 = arith.constant 0 : i32
    return %c0_i32, %c0_i32_0, %c0_i32_1 : i32, i32, i32
  }
  func.func @transform_4(%arg0: i32, %arg1: i32) -> (i32, i32, i32) {
    %c0_i32 = arith.constant 0 : i32
    %c0_i32_0 = arith.constant 0 : i32
    return %arg0, %c0_i32, %arg1 : i32, i32, i32
  }
}

</mosaic_0001>

<bundles_post_ra>
// kernel: tpu_custom_call.1
= control target key start
LH: loop header
LB: loop body
LE: loop exit
PB: predicated region body
PF: predicated region fallthrough
CT: control target
= control target key end

     0   :  { %9 = vsyncpa [#allocation3], 0  ;;  %s646_s0 = inlined_call_operand.vmem [shape: f32[2,4,16], index: 0, kind: input, shape index: {}]   ;;  %s647_s1 = inlined_call_operand.vmem [shape: f32[2,1,16], index: 1, kind: input, shape index: {}]   ;;  %s648_s2 = inlined_call_operand.vmem [shape: f32[1,4,1], index: 2, kind: input, shape index: {}]   ;;  %s649_s3 = inlined_call_operand.vmem [shape: f32[1,4,1], index: 3, kind: input, shape index: {}]   ;;  %s650_s4 = inlined_call_operand.hbm [shape: f32[2,4,16], index: 4, kind: output, shape index: {}]  }
   0x1   :  { %11 = vsyncpa [#allocation3 + $0x1], 0  ;;  %s540_s15 = smov 0   ;;  %s542_s16 = smov 0  }
   0x2   :  { %s544_s17 = smov 0   ;;  %s546_s18 = smov 0  }
   0x3   :  { %s548_s19 = smov 0   ;;  %s550_s20 = smov 0  }
   0x4 LB: > { %s365_s21 = sadd.s32 4294967295, %s512_s20   ;;  %s366_s22 = sadd.s32 4294967294, %s512_s20   ;;  %s512_s20 = sphi %s550_s20, %s17_s20   ;;  %s508_s19 = sphi %s548_s19, %s657_s19   ;;  %s504_s18 = sphi %s546_s18, %s656_s18   ;;  %s500_s17 = sphi %s544_s17, %s655_s17   ;;  %s496_s16 = sphi %s542_s16, %s654_s16   ;;  %s492_s15 = sphi %s540_s15, %s653_s15  }
   0x5   : > { %s29_s23 = sadd.s32 1, %s508_s19  ;;  %s136_s24 = sadd.s32 1, %s500_s17 }
   0x6   : > { %p31_p0 = scmp.ge.s32.totalorder %s29_s23, 2  ;;  %p146_p1 = scmp.ne.s32.totalorder %s500_s17, %s496_s16 }
   0x7   : > { %p147_p2 = scmp.eq.s32.totalorder %s365_s21, 1  ;;  %p152_p3 = scmp.ne.s32.totalorder %s496_s16, %s492_s15 }
   0x8   : > { %s659_s23 = smov (%p31_p0, %s29_s23), 0  ;;  %p153_p5 = scmp.eq.s32.totalorder %s366_s22, 1 }
   0x9   : > { %p580_p4 = por %p147_p2, %p146_p1  ;;  %s131_s26 = ssub.s32 %s508_s19, %s659_s23 }
   0xa   : > { %p369_p6 = scmp.ge.s32.totalorder %s512_s20, 1  ;;  %p134_p7 = scmp.eq.s32.totalorder %s131_s26, 0 }
   0xb   : > { %p587_p8 = por %p153_p5, %p152_p3  ;;  %p196_p9 = scmp.lt.s32.totalorder %s512_s20, 3 }
   0xc   : > { %s593_s28 = scalar_select %p134_p7, %s500_s17, %s136_s24  }
   0xd   : > { %p197_p10 = pnand %p369_p6, %p196_p9 }
   0xe   : > { %p230_p11 = scmp.lt.s32.totalorder (!%p197_p10), %s504_s18, 1  ;;  %s227_s12 = sand.u32 (!%p197_p10), 1, %s496_s16  }
   0xf   : > { %200 = sbr.rel (%p197_p10) target bundleno = 152 (0x98), region = 36  ;;  %s370_s22 = sshll.u32 (!%p197_p10), %s227_s12, 2 }
  0x10   : > { %s373_s24 = sshll.u32 (!%p197_p10), %s504_s18, 2  ;;  %s229_s6 = scalar_lea.vmem (!%p197_p10), [#allocation2], %s370_s22 }
  0x11   : > { %s277_s30 = scalar_lea.hbm (!%p197_p10), %s650_s4, %s373_s24  ;;  %s279_s7 = sshll.u32 (!%p197_p10), %s229_s6, 4  ;;  %s280_s7 = int_to_ptr.vmem [resolvable:$true] %s279_s7 }
  0x12   : > { %s266_s9 = scalar_lea.sflag (!%p197_p10), [#allocation3], %s227_s12  ;;  %s454_s13 = scalar_lea.hbm (!%p197_p10), %s650_s4, 8 }
  0x14   : > { %v245_v0 = vld [vmem:[%s648_s2] sm:$0xf]  ;;  %v514_v1 = vmov 0   ;;  %s231_s5 = scalar_select %p230_p11, %s504_s18, 1  ;;  %vm263_vm0 = vcmask 125952  }
  0x15   : > { %432 = vset.pattern.permute.xlu0 %v514_v1  ;;  %v246_v2 = vld [vmem:[%s649_s3] sm:$0xf] }
  0x16   : > { %249 = vperm.xlu0 %432, %v245_v0   ;;  %s242_s8 = scalar_lea.vmem %s647_s1, %s231_s5  ;;  %s371_s11 = sshll.u32 %s231_s5, 2 }
  0x17   : > { %s236_s21 = scalar_lea.vmem %s646_s0, %s371_s11  ;;  %v433_v6 = vld [vmem:[%s242_s8] ss:$0 sm:$0xff]  ;;  %s281_s5 = sshll.u32 %s277_s30, 4  ;;  %s282_s5 = int_to_ptr.hbm [resolvable:$true] %s281_s5 }
  0x18   : > { %v243_v4 = vld [vmem:[%s236_s21] sm:$0xf]  ;;  %s448_s18 = sshra.s32 %s282_s5, 4  ;;  %s449_s18 = int_to_ptr.hbm [resolvable:$true] %s448_s18 }
  0x19   : > { %s450_s10 = scalar_lea.hbm %s449_s18, 4  ;;  %p455_p1 = scmp.lt.s32.totalorder %s449_s18, %s650_s4 }
  0x1a   : > { %p451_p12 = scmp.ne.s32.totalorder %s449_s18, %s450_s10  ;;  %p456_p2 = scmp.lt.s32.totalorder %s454_s13, %s450_s10 }
  0x1c   : > { %p452_p13 = pnand %p451_p12, %p580_p4  ;;  %p457_p3 = por %p456_p2, %p455_p1 }
  0x1e   : > { %255 = vperm.xlu0 %432, %v246_v2   ;;  %p453_p0 = pneg %p452_p13 }
  0x20   : > { %p458_p5 = pnand %p457_p3, %p453_p0 }
  0x88   : > { %v250_v3 = vpop.permute.xlu0 %249 }
  0x89   : > { %v252_v5 = vmul.f32 %v250_v3, %v243_v4 }
  0x90   : > { %v256_v7 = vpop.permute.xlu0 %255 }
  0x91   : > { %v258_v8 = vadd.f32 %v256_v7, %v252_v5 }
  0x93   : > { %v262_v9 = vmul.f32 %v433_v6, %v258_v8 }
  0x95   : > { %264 = vst.msk [vmem:[%s229_s6] sm:$0xf] %vm263_vm0, %v262_v9 }
  0x96   : > { %461 = shalt.err (!%p458_p5)
}
  0x97   : > { %376 = dma.vmem_to_hbm [thread:$0]  (%p580_p4), %s280_s7, 64, %s282_s5, %s266_s9  }
  0x98 PF: > { %p382_p6 = scmp.ge.s32.totalorder %s512_s20, 2  ;;  %s293_s12 = sand.u32 1, %s492_s15  }
  0x99   : > { %s294_s22 = scalar_lea.sflag [#allocation3], %s293_s12 }
  0x9a   : > { %p379_p7 = pnand %p382_p6, %p587_p8 }
  0x9c   : > { %p380_p9 = pneg %p379_p7 }
  0x9e   : > { %487 = dma.done.wait (%p380_p9), %s294_s22, 64  }
  0x9f   : > { %489 = vsyncadd (%p380_p9), %s294_s22, 4294967232  ;;  %s17_s20 = sadd.s32 1, %s512_s20   ;;  %s653_s15 = smov %s496_s16 }
  0xa0   : > { %p14_p10 = scmp.ge.s32.totalorder %s17_s20, 4   ;;  %s654_s16 = smov %s500_s17 }
  0xa1   : > { %s655_s17 = smov %s593_s28  ;;  %s656_s18 = smov %s508_s19 }
  0xa2   : > { %s657_s19 = smov %s659_s23  ;;  %16 = sbr.rel (!%p14_p10) target bundleno = 4 (0x4), region = 74 }
  0xa7   :  { %300 = vsyncpa [#allocation3], 1 }
  0xa8   :  { %302 = vsyncpa [#allocation3 + $0x1], 1 }

</bundles_post_ra>
